<compile_context>
chip_gen: v7x
topology: tpu7x:2x2x1
jax: 0.10.0
libtpu: 0.0.40
codegen_flags: <defaults>
</compile_context>

<pallas_src>
import functools

import jax
import jax.numpy as jnp
from jax import lax
from jax.experimental import pallas as pl
from jax.experimental.pallas import tpu as pltpu

_LANE = 128                      # TPU lane width (last-dim tiling unit)
_F_TILE_BYTES = 8 * 1024 * 1024  # budget for ONE streamed F tile (x2 double-buffered)


def _plan_k_tiles(nc, hw, itemsize, max_tk):
    """Pick a K (= H*W) tile size and the zero-padded K extent.

    Streamed F blocks are (nc, tk): nc is always the full sublane extent (legal
    for any nc, incl. bf16 (16,128) packing); tk must be a multiple of 128 lanes
    unless a single block covers the whole (possibly small) H*W extent.
    """
    if hw <= max_tk and nc * hw * itemsize <= _F_TILE_BYTES:
        return hw, hw                                    # single full-extent block
    cap = min(max_tk, max(_LANE, _F_TILE_BYTES // max(nc * itemsize, 1)))
    cap = max(_LANE, (min(cap, hw) // _LANE) * _LANE)    # lane-aligned, <= hw
    tk = cap
    while tk > _LANE and hw % tk:                        # prefer an exact divisor
        tk -= _LANE
    if hw % tk:
        tk = cap                                         # no divisor: zero-pad K
    padded = ((hw + tk - 1) // tk) * tk
    return tk, padded


def _vmem_limit_bytes(nc, tk, itemsize):
    streamed = 2 * nc * tk * itemsize       # double-buffered F tiles
    resident = 4 * nc * nc * 4              # target (+ buffer) / accumulator / output (f32)
    need = streamed + resident + (8 << 20)  # headroom for compiler-internal scratch
    # Above every chip's default scoped limit, below v7x's 64 MiB physical VMEM.
    return int(min(max(need, 32 << 20), 48 << 20))


# ---------------------------------------------------------------------------
# Kernels: 1-D grid over K = H*W tiles, reduction axis marked "arbitrary".
# ---------------------------------------------------------------------------
def _gram_kernel(inv_norm, compute_dtype, f_ref, g_ref, acc_ref):
    """G = (F @ F^T) * inv_norm, accumulated over K tiles in a f32 VMEM scratch."""
    k = pl.program_id(0)

    @pl.when(k == 0)
    def _init():
        acc_ref[...] = jnp.zeros_like(acc_ref)

    f = f_ref[...].astype(compute_dtype)              # bf16 (or f32) feed, f32 accumulate
    acc_ref[...] += lax.dot_general(                  # NT contraction: no f.T transpose
        f, f,
        dimension_numbers=(((1,), (1,)), ((), ())),
        preferred_element_type=jnp.float32)

    @pl.when(k == pl.num_programs(0) - 1)
    def _finalize():
        g_ref[...] = acc_ref[...] * inv_norm


def _style_loss_kernel(inv_norm, inv_nelem, compute_dtype,
                       f_ref, tgt_ref, loss_ref, acc_ref):
    """loss = mean((gram(F) - target)^2), fused with the tiled Gram reduction."""
    k = pl.program_id(0)

    @pl.when(k == 0)
    def _init():
        acc_ref[...] = jnp.zeros_like(acc_ref)

    f = f_ref[...].astype(compute_dtype)
    acc_ref[...] += lax.dot_general(
        f, f,
        dimension_numbers=(((1,), (1,)), ((), ())),
        preferred_element_type=jnp.float32)

    @pl.when(k == pl.num_programs(0) - 1)
    def _finalize():
        d = acc_ref[...] * inv_norm - tgt_ref[...]
        loss_ref[0, 0] = jnp.sum(d * d) * inv_nelem   # scalar result exits through SMEM


# ---------------------------------------------------------------------------
# Wrappers
# ---------------------------------------------------------------------------
def gram_matrix(x_nchw, *, compute_dtype=jnp.bfloat16, max_tk=2048):
    """Pallas Gram matrix: (N, C, H, W) -> (N*C, N*C) float32."""
    n, c, h, w = x_nchw.shape
    nc, hw = n * c, h * w
    f = x_nchw.reshape(nc, hw)
    itemsize = f.dtype.itemsize
    tk, padded_hw = _plan_k_tiles(nc, hw, itemsize, max_tk)
    if padded_hw != hw:
        f = jnp.pad(f, ((0, 0), (0, padded_hw - hw)))   # zero lanes don't change F@F^T
    num_k = padded_hw // tk
    inv_norm = 1.0 / float(nc * hw)
    return pl.pallas_call(
        functools.partial(_gram_kernel, inv_norm, compute_dtype),
        out_shape=jax.ShapeDtypeStruct((nc, nc), jnp.float32),
        grid=(num_k,),
        in_specs=[pl.BlockSpec((nc, tk), lambda k: (0, k))],     # streamed F tiles
        out_specs=pl.BlockSpec((nc, nc), lambda k: (0, 0)),      # resident output block
        scratch_shapes=[pltpu.VMEM((nc, nc), jnp.float32)],      # f32 accumulator
        compiler_params=pltpu.CompilerParams(
            dimension_semantics=("arbitrary",),                  # K is a reduction axis
            vmem_limit_bytes=_vmem_limit_bytes(nc, tk, itemsize)),
    )(f)


def _style_loss_impl(x_nchw, target_gram, compute_dtype, max_tk):
    n, c, h, w = x_nchw.shape
    nc, hw = n * c, h * w
    f = x_nchw.reshape(nc, hw)
    itemsize = f.dtype.itemsize
    tk, padded_hw = _plan_k_tiles(nc, hw, itemsize, max_tk)
    if padded_hw != hw:
        f = jnp.pad(f, ((0, 0), (0, padded_hw - hw)))
    num_k = padded_hw // tk
    inv_norm = 1.0 / float(nc * hw)
    inv_nelem = 1.0 / float(nc * nc)
    target_gram = target_gram.astype(jnp.float32)
    loss = pl.pallas_call(
        functools.partial(_style_loss_kernel, inv_norm, inv_nelem, compute_dtype),
        out_shape=jax.ShapeDtypeStruct((1, 1), jnp.float32),
        grid=(num_k,),
        in_specs=[
            pl.BlockSpec((nc, tk), lambda k: (0, k)),   # streamed, double-buffered F
            pl.BlockSpec((nc, nc), lambda k: (0, 0)),   # target gram: DMA'd once, resident
        ],
        out_specs=pl.BlockSpec(memory_space=pltpu.MemorySpace.SMEM),  # scalar via SMEM
        scratch_shapes=[pltpu.VMEM((nc, nc), jnp.float32)],           # f32 accumulator
        compiler_params=pltpu.CompilerParams(
            dimension_semantics=("arbitrary",),
            vmem_limit_bytes=_vmem_limit_bytes(nc, tk, itemsize)),
    )(f, target_gram)
    return loss[0, 0]


@functools.partial(jax.custom_vjp, nondiff_argnums=(2, 3))
def style_loss_value(x_nchw, target_gram, compute_dtype=jnp.bfloat16, max_tk=2048):
    """Fused Pallas gram + MSE; differentiable w.r.t. x via a custom VJP."""
    return _style_loss_impl(x_nchw, target_gram, compute_dtype, max_tk)


def _style_loss_fwd(x_nchw, target_gram, compute_dtype, max_tk):
    return _style_loss_impl(x_nchw, target_gram, compute_dtype, max_tk), (x_nchw, target_gram)


def _style_loss_bwd(compute_dtype, max_tk, residuals, g):
    # pallas_call is not differentiable by default; this VJP lets the style loss
    # backprop into the input image:  dL/dF = 4/nc^2 * inv_norm * (G - T) @ F.
    x_nchw, target_gram = residuals
    n, c, h, w = x_nchw.shape
    nc, hw = n * c, h * w
    inv_norm = 1.0 / float(nc * hw)
    inv_nelem = 1.0 / float(nc * nc)
    f = x_nchw.reshape(nc, hw).astype(jnp.float32)
    gram = gram_matrix(x_nchw, compute_dtype=compute_dtype, max_tk=max_tk)
    diff = gram - target_gram.astype(jnp.float32)                # symmetric
    d_f = (4.0 * inv_nelem * inv_norm * g) * jnp.matmul(diff, f)
    d_x = d_f.reshape(x_nchw.shape).astype(x_nchw.dtype)
    d_target = ((-2.0 * inv_nelem) * g) * diff
    return d_x, d_target.astype(target_gram.dtype)


style_loss_value.defvjp(_style_loss_fwd, _style_loss_bwd)


class StyleLoss:
    """Mirror of the PyTorch StyleLoss module: the target Gram is precomputed
    ("detached") at init; __call__ stores the MSE loss and returns its input."""

    def __init__(self, target_feature, compute_dtype=jnp.bfloat16, max_tk=2048):
        self.compute_dtype = compute_dtype
        self.max_tk = max_tk
        self.target = jax.lax.stop_gradient(
            gram_matrix(target_feature, compute_dtype=compute_dtype, max_tk=max_tk))
        self.loss = None

    def __call__(self, x):
        self.loss = style_loss_value(x, self.target, self.compute_dtype, self.max_tk)
        return x


# ---------------------------------------------------------------------------
# Demo / self-check
# ---------------------------------------------------------------------------
if __name__ == "__main__":
    key = jax.random.PRNGKey(0)
    k1, k2, k3, k4, k5, k6 = jax.random.split(key, 6)

    def ref_gram(t, cast_dtype=None):
        a, b, cc, d = t.shape
        f = t.reshape(a * b, cc * d)
        if cast_dtype is not None:
            f = f.astype(cast_dtype)
        f = f.astype(jnp.float32)
        return (f @ f.T) / (a * b * cc * d)

    def ref_loss(x, t, cast_dtype=None):
        return jnp.mean((ref_gram(x, cast_dtype) - ref_gram(t, cast_dtype)) ** 2)

    # --- 1) small NCHW feature map, exact float32 MXU path -----------------
    n, c, h, w = 2, 4, 16, 16
    tgt_feat = jax.random.normal(k1, (n, c, h, w), jnp.float32)
    x = jax.random.normal(k2, (n, c, h, w), jnp.float32)

    mod_f32 = StyleLoss(tgt_feat, compute_dtype=jnp.float32)
    out = jax.block_until_ready(mod_f32(x))
    loss_f32 = jax.block_until_ready(mod_f32.loss)
    assert out.shape == x.shape and bool(jnp.allclose(out, x))
    l_ref = ref_loss(x, tgt_feat)
    assert jnp.allclose(loss_f32, l_ref, rtol=1e-5, atol=1e-6), (loss_f32, l_ref)

    # gradient w.r.t. the input image through the custom VJP
    tgt_gram = jax.lax.stop_gradient(gram_matrix(tgt_feat, compute_dtype=jnp.float32))
    g_pallas = jax.block_until_ready(
        jax.grad(lambda xx: style_loss_value(xx, tgt_gram, jnp.float32, 2048))(x))
    g_ref = jax.grad(lambda xx: ref_loss(xx, tgt_feat))(x)
    assert jnp.allclose(g_pallas, g_ref, rtol=5e-3, atol=1e-9), "grad mismatch"

    # --- 2) default bfloat16-fed MXU path (f32 accumulation) ---------------
    mod_bf16 = StyleLoss(tgt_feat)                      # compute_dtype=bfloat16
    _ = mod_bf16(x)
    loss_bf16 = jax.block_until_ready(mod_bf16.loss)
    l_ref_q = ref_loss(x, tgt_feat, cast_dtype=jnp.bfloat16)
    assert jnp.allclose(loss_bf16, l_ref_q, rtol=1e-3, atol=1e-8), (loss_bf16, l_ref_q)

    # --- 3) moderate shape: multi-step K reduction (nc=256, 4 K tiles) -----
    n2, c2, h2, w2 = 2, 128, 32, 32
    t2 = jax.random.normal(k3, (n2, c2, h2, w2), jnp.float32)
    x2 = jax.random.normal(k4, (n2, c2, h2, w2), jnp.float32)
    mod2 = StyleLoss(t2, compute_dtype=jnp.bfloat16, max_tk=256)
    _ = mod2(x2)
    l2 = jax.block_until_ready(mod2.loss)
    l2_ref = ref_loss(x2, t2, cast_dtype=jnp.bfloat16)
    assert jnp.allclose(l2, l2_ref, rtol=1e-3, atol=1e-10), (l2, l2_ref)

    # --- 4) H*W not a multiple of 128: zero-padded K tiles (f32) -----------
    n3, c3, h3, w3 = 1, 8, 12, 12                       # hw=144 -> padded to 2x128 tiles
    t3 = jax.random.normal(k5, (n3, c3, h3, w3), jnp.float32)
    x3 = jax.random.normal(k6, (n3, c3, h3, w3), jnp.float32)
    tg3 = jax.lax.stop_gradient(gram_matrix(t3, compute_dtype=jnp.float32, max_tk=128))
    l3 = jax.block_until_ready(style_loss_value(x3, tg3, jnp.float32, 128))
    l3_ref = ref_loss(x3, t3)
    assert jnp.allclose(l3, l3_ref, rtol=1e-5, atol=1e-7), (l3, l3_ref)

    print("KERNEL_OK")
</pallas_src>

<mosaic_0001>
module attributes {stable_mosaic.version = 11 : i64} {
  func.func @_gram_kernel(%arg0: i32, %arg1: memref<8x256xf32, #tpu.memory_space<vmem>>, %arg2: memref<8x8xf32, #tpu.memory_space<vmem>>, %arg3: memref<8x8xf32, #tpu.memory_space<vmem>>) attributes {dimension_semantics = [#tpu.dimension_semantics<arbitrary>], iteration_bounds = array<i64: 1>, scalar_prefetch = 0 : i64, scratch_operands = 1 : i64, tpu.core_type = #tpu.core_type<tc>, window_params = [{transform_indices = @transform_0, window_bounds = array<i64: 8, 256>}, {pipeline_mode = #tpu.pipeline_mode<synchronous>, transform_indices = @transform_1, window_bounds = array<i64: 8, 8>}]} {
    %c0_i32 = arith.constant 0 : i32
    %0 = arith.cmpi eq, %arg0, %c0_i32 : i32
    %1 = arith.extui %0 : i1 to i32
    %c0_i32_0 = arith.constant 0 : i32
    %2 = arith.cmpi ne, %1, %c0_i32_0 : i32
    scf.if %2 {
      %cst_8 = arith.constant 0.000000e+00 : f32
      %11 = vector.broadcast %cst_8 : f32 to vector<8x8xf32>
      %c0_9 = arith.constant 0 : index
      %c0_10 = arith.constant 0 : index
      %12 = vector.load %arg3[%c0_9, %c0_10] : memref<8x8xf32, #tpu.memory_space<vmem>>, vector<8x8xf32>
      tpu.vector_store %arg3[%c0_9, %c0_10], %11 {strides = array<i32>} : memref<8x8xf32, #tpu.memory_space<vmem>>, vector<8x8xf32>,
    } else {
    }
    %c0 = arith.constant 0 : index
    %c0_1 = arith.constant 0 : index
    %3 = vector.load %arg1[%c0, %c0_1] : memref<8x256xf32, #tpu.memory_space<vmem>>, vector<8x256xf32>
    %c0_2 = arith.constant 0 : index
    %c0_3 = arith.constant 0 : index
    %4 = vector.load %arg3[%c0_2, %c0_3] : memref<8x8xf32, #tpu.memory_space<vmem>>, vector<8x8xf32>
    %cst = arith.constant dense<0.000000e+00> : vector<8x8xf32>
    %5 = tpu.matmul %3, %3, %cst {dimension_numbers = #tpu.dot_dimension_numbers<[1], [1], [0], [0], [0, 0, 1, 0], [], []>} : vector<8x256xf32>, vector<8x256xf32>, vector<8x8xf32> -> vector<8x8xf32>
    %6 = arith.addf %4, %5 : vector<8x8xf32>
    %c0_4 = arith.constant 0 : index
    %c0_5 = arith.constant 0 : index
    %7 = vector.load %arg3[%c0_4, %c0_5] : memref<8x8xf32, #tpu.memory_space<vmem>>, vector<8x8xf32>
    tpu.vector_store %arg3[%c0_4, %c0_5], %6 {strides = array<i32>} : memref<8x8xf32, #tpu.memory_space<vmem>>, vector<8x8xf32>,
    %c0_i32_6 = arith.constant 0 : i32
    %8 = arith.cmpi eq, %arg0, %c0_i32_6 : i32
    %9 = arith.extui %8 : i1 to i32
    %c0_i32_7 = arith.constant 0 : i32
    %10 = arith.cmpi ne, %9, %c0_i32_7 : i32
    scf.if %10 {
      %c0_8 = arith.constant 0 : index
      %c0_9 = arith.constant 0 : index
      %11 = vector.load %arg3[%c0_8, %c0_9] : memref<8x8xf32, #tpu.memory_space<vmem>>, vector<8x8xf32>
      %cst_10 = arith.constant 4.8828125E-4 : f32
      %12 = vector.broadcast %cst_10 : f32 to vector<8x8xf32>
      %13 = arith.mulf %11, %12 : vector<8x8xf32>
      %c0_11 = arith.constant 0 : index
      %c0_12 = arith.constant 0 : index
      %14 = vector.load %arg2[%c0_11, %c0_12] : memref<8x8xf32, #tpu.memory_space<vmem>>, vector<8x8xf32>
      tpu.vector_store %arg2[%c0_11, %c0_12], %13 {strides = array<i32>} : memref<8x8xf32, #tpu.memory_space<vmem>>, vector<8x8xf32>,
    } else {
    }
    return
  }
  func.func @transform_0(%arg0: i32) -> (i32, i32) {
    %c0_i32 = arith.constant 0 : i32
    %c0_i32_0 = arith.constant 0 : i32
    return %c0_i32, %arg0 : i32, i32
  }
  func.func @transform_1(%arg0: i32) -> (i32, i32) {
    %c0_i32 = arith.constant 0 : i32
    %c0_i32_0 = arith.constant 0 : i32
    %c0_i32_1 = arith.constant 0 : i32
    return %c0_i32, %c0_i32_0 : i32, i32
  }
}

</mosaic_0001>

<bundles_post_ra>
// kernel: tpu_custom_call.1
= control target key start
LH: loop header
LB: loop body
LE: loop exit
PB: predicated region body
PF: predicated region fallthrough
CT: control target
= control target key end

     0   :  { %6 = vsyncpa [#allocation4], 0  ;;  %s215_s0 = inlined_call_operand.hbm [shape: f32[8,256], index: 0, kind: input, shape index: {}]   ;;  %s216_s1 = inlined_call_operand.hbm [shape: f32[8,8], index: 1, kind: output, shape index: {}]  }
   0x1   :  { %7 = vsyncpa [#allocation5], 0  ;;  %s175_s6 = smov [#allocation3]   ;;  %s127_s10 = scalar_lea.hbm %s215_s0, 256 }
   0x2   :  { %s14_s7 = sshll.u32 %s175_s6, 4  ;;  %p128_p0 = scmp.ne.s32.totalorder %s215_s0, %s127_s10  ;;  %s15_s7 = int_to_ptr.vmem [resolvable:$true] %s14_s7 }
   0x3   :  { %p131_p1 = scmp.lt.u32.totalorder %s127_s10, %s215_s0 }
   0x5   :  { %p133_p2 = pnand %p131_p1, %p128_p0 }
   0x7   :  { %136 = shalt.err (!%p133_p2)
}
   0x8   :  { %s137_s15 = scalar_lea.vmem %s15_s7, 256  ;;  %p142_p4 = scmp.lt.s32.totalorder %s15_s7, %s15_s7 }
   0x9   :  { %p138_p3 = scmp.ne.s32.totalorder %s15_s7, %s137_s15  ;;  %p143_p5 = scmp.lt.s32.totalorder %s137_s15, %s137_s15 }
   0xb   :  { %p144_p6 = por %p143_p5, %p142_p4 }
   0xd   :  { %p145_p7 = pnand %p144_p6, %p138_p3 }
   0xf   :  { %148 = shalt.err (!%p145_p7)
}
  0x10   :  { %17 = dma.hbm_to_vmem [thread:$0]  %s215_s0, 256, %s15_s7, [#allocation4]  }
  0x11   :  { %171 = dma.done.wait [#allocation4], 256  }
  0x12   :  { %172 = vsyncadd [#allocation4], 4294967040  ;;  %vm25_vm0 = vcmask 64512   ;;  %v176_v0 = vmov 0.0   ;;  %v28_v1 = vld [vmem:[#allocation3 + $0x8] sm:$0xff]  ;;  %v27_v2 = vld [vmem:[#allocation3] sm:$0xff] }
  0x13   :  { %26 = vst.msk [vmem:[#allocation2] sm:$0xff] %vm25_vm0, %v176_v0  ;;  %30 = vmatprep.subr.mxu0 %v28_v1  ;;  %94 = vmatprep.mubr.f32.mxu0 %v28_v1  ;;  %s177_s18 = smov [#allocation6]  }
  0x14   :  { %31 = vmatpush1.xpose.msra.mxu0 %v27_v2  ;;  %s115_s0 = sshll.u32 %s177_s18, 4  ;;  %s116_s0 = int_to_ptr.vmem [resolvable:$true] %s115_s0 }
  0x15   :  { %s149_s19 = scalar_lea.vmem %s116_s0, 128  ;;  %p154_p9 = scmp.lt.s32.totalorder %s116_s0, %s116_s0 }
  0x16   :  { %p150_p8 = scmp.ne.s32.totalorder %s116_s0, %s149_s19  ;;  %p155_p10 = scmp.lt.s32.totalorder %s149_s19, %s149_s19 }
  0x17   :  { %95 = vmatmul.mubr.f32.vlgmr.msra.gmra.mrb[0].mxu0 %v27_v2 }
  0x18   :  { %p156_p11 = por %p155_p10, %p154_p9 }
  0x1a   :  { %v29_v3 = vld [vmem:[#allocation2] sm:$0xff]  ;;  %p157_p12 = pnand %p156_p11, %p150_p8 }
  0xea   :  { %v96_v4 = vpop.f32.mrb[0].mxu0 }
  0xeb   :  { %v100_v5 = vadd.f32 %v96_v4, %v29_v3  ;;  %v98_v6 = vpop.f32.mrb[1].mxu0 }
  0xed   :  { %102 = vst.msk [vmem:[#allocation2] sm:$0xff] %vm25_vm0, %v100_v5 }
  0xf4   :  { %v106_v7 = vld [vmem:[#allocation2] sm:$0xff] }
  0xf5   :  { %v107_v8 = vmul.f32 0.00048828125, %v106_v7 }
  0xf7   :  { %108 = vst.msk [vmem:[#allocation6] sm:$0xff] %vm25_vm0, %v107_v8 }
  0xf8   :  { %160 = shalt.err (!%p157_p12)
}
  0xf9   :  { %s161_s22 = scalar_lea.hbm %s216_s1, 128 }
  0xfa   :  { %p162_p13 = scmp.ne.s32.totalorder %s216_s1, %s161_s22  ;;  %p165_p0 = scmp.lt.u32.totalorder %s161_s22, %s216_s1 }
  0xfc   :  { %p167_p1 = pnand %p165_p0, %p162_p13 }
  0xfe   :  { %170 = shalt.err (!%p167_p1)
}
  0xff   :  { %118 = dma.vmem_to_hbm [thread:$0]  %s116_s0, 128, %s216_s1, [#allocation5]  }
 0x100   :  { %173 = dma.done.wait [#allocation5], 128  }
 0x101   :  { %174 = vsyncadd [#allocation5], 4294967168 }
 0x102   :  { %122 = vsyncpa [#allocation4], 1 }
 0x103   :  { %123 = vsyncpa [#allocation5], 1 }

</bundles_post_ra>
